<compile_context>
chip_gen: v5e
topology: v5e:2x2
jax: 0.10.0
libtpu: 0.0.40
codegen_flags: <defaults>
</compile_context>

<pallas_src>
import functools

import jax
import jax.numpy as jnp
from jax.experimental import pallas as pl
from jax.experimental.pallas import tpu as pltpu

LANE = 128
SUBL = 8


def _static_pow(x, e):
    """x ** e as a multiply chain for small static integer e (no EUP pow)."""
    e = float(e)
    if e == int(e) and 0 <= int(e) <= 8:
        n = int(e)
        if n == 0:
            return jnp.ones_like(x)
        r = x
        for _ in range(n - 1):
            r = r * x
        return r
    # Non-integer exponent: one extra log + exp (EUP) per element per use.
    # TODO(synk): if non-integer alfa becomes common, reuse the already
    # computed log instead of paying a fresh one here.
    return jnp.exp(e * jnp.log(jnp.maximum(x, 1e-30)))


def _focal_loss_kernel(x_ref, lab_ref, out_ref, acc_pt_ref, acc_bg_ref, *, alfa, beta):
    c = pl.program_id(2)
    n_chan = pl.num_programs(2)

    @pl.when(c == 0)
    def _():
        acc_pt_ref[...] = jnp.zeros_like(acc_pt_ref)
        acc_bg_ref[...] = jnp.zeros_like(acc_bg_ref)

    x = x_ref[0, 0].astype(jnp.float32)   # (tR, 128) logits for channel c
    lab = lab_ref[0]                      # (tR, 128) int32 labels (resident over c)

    # Single-EUP sigmoid; clamp like the reference (upper clamp is the one
    # that matters, lower clamp guards tanh rounding).
    p = jnp.clip(0.5 * jnp.tanh(0.5 * x) + 0.5, 0.0, 1.0 - 1e-4)

    fg = (lab == c).astype(jnp.float32)   # labels_layered[:, c]

    # Ungated background term — the only log in the dense channel loop.
    bg_all = _static_pow(p, alfa) * jnp.log((1.0 - p) + 1e-5)

    acc_pt_ref[...] += fg * p                                   # p at the true channel
    acc_bg_ref[...] += jnp.sum(bg_all, axis=0, keepdims=True)   # XLU (idle) partial sums

    @pl.when(c == n_chan - 1)
    def _():
        valid = jnp.logical_and(lab >= 0, lab < n_chan).astype(jnp.float32)
        p_t = acc_pt_ref[...]
        one_m_pt = 1.0 - p_t
        pos = valid * _static_pow(one_m_pt, alfa) * jnp.log(p_t + 1e-5)
        if float(beta) == 0.0:
            # (1 - onehot)**0 == 1 everywhere -> no foreground correction.
            corr_sum = jnp.float32(0.0)
        else:
            # (1 - onehot)**beta == (1 - onehot) for any beta > 0 on a {0,1} mask.
            corr_sum = jnp.sum(valid * _static_pow(p_t, alfa)
                               * jnp.log(one_m_pt + 1e-5))
        s_pos = jnp.sum(pos)
        s_cnt = jnp.sum(valid)
        s_bg = jnp.sum(acc_bg_ref[...]) - corr_sum
        row = jax.lax.broadcasted_iota(jnp.int32, (SUBL, LANE), 0)
        out_ref[0, 0] = jnp.where(
            row == 0, s_pos,
            jnp.where(row == 1, s_cnt, jnp.where(row == 2, s_bg, 0.0)))


def _choose_tile_rows(rows, n_batch, target_bytes=2 << 20):
    """Spatial tile = tR rows of 128 lanes; tR multiple of 8, ~target_bytes f32."""
    target_rows = max(SUBL, (target_bytes // (LANE * 4)) // SUBL * SUBL)  # 4096
    tR = min(target_rows, rows)
    tR = max(SUBL, (tR // SUBL) * SUBL)
    if n_batch == 1:
        # v7x megacore: keep at least 2 "parallel" blocks when possible.
        min_tr = 16
        while tR > min_tr and pl.cdiv(rows, tR) < 2:
            tR = max(min_tr, (tR // 2 // SUBL) * SUBL)
    return tR


def focal_loss_pallas(output, labels, alfa=2.0, beta=4.0):
    """output: (N, C, H, W) float logits; labels: (N, H, W) integer class ids."""
    N, C, H, W = output.shape
    S = H * W
    labels = labels.astype(jnp.int32)

    x = output.reshape(N, C, S)           # free views on contiguous dims
    lab = labels.reshape(N, S)

    rows = pl.cdiv(S, LANE)
    rows = pl.cdiv(rows, SUBL) * SUBL
    tR = _choose_tile_rows(rows, N)
    nS = pl.cdiv(rows, tR)
    rows_pad = nS * tR
    S_pad = rows_pad * LANE

    if S_pad != S:
        # Pad logits with -30 (p ~ 1e-13 -> ~0 contribution) and labels with
        # -1 (invalid -> excluded from foreground mean).  Exact grid, no
        # in-kernel tail masking needed.
        x = jnp.pad(x, ((0, 0), (0, 0), (0, S_pad - S)), constant_values=-30.0)
        lab = jnp.pad(lab, ((0, 0), (0, S_pad - S)), constant_values=-1)

    x = x.reshape(N, C, rows_pad, LANE)
    lab = lab.reshape(N, rows_pad, LANE)

    kernel = functools.partial(_focal_loss_kernel, alfa=float(alfa), beta=float(beta))

    psum = pl.pallas_call(
        kernel,
        out_shape=jax.ShapeDtypeStruct((N, nS, SUBL, LANE), jnp.float32),
        grid=(N, nS, C),
        in_specs=[
            pl.BlockSpec((1, 1, tR, LANE), lambda n, s, c: (n, c, s, 0)),
            pl.BlockSpec((1, tR, LANE), lambda n, s, c: (n, s, 0)),  # resident over c
        ],
        out_specs=pl.BlockSpec((1, 1, SUBL, LANE), lambda n, s, c: (n, s, 0, 0)),
        scratch_shapes=[
            pltpu.VMEM((tR, LANE), jnp.float32),   # p at the true channel
            pltpu.VMEM((1, LANE), jnp.float32),    # lane-partial background sums
        ],
        compiler_params=pltpu.CompilerParams(
            dimension_semantics=("parallel", "parallel", "arbitrary"),
        ),
    )(x, lab)

    parts = psum[:, :, :3, 0]            # (N, nS, 3): [pos_sum, fg_count, bg_sum]
    pos_sum = jnp.sum(parts[..., 0])
    fg_count = jnp.sum(parts[..., 1])
    bg_sum = jnp.sum(parts[..., 2])

    loss_point = pos_sum / fg_count      # NaN if no valid labels (matches reference)
    loss_background = bg_sum / jnp.float32(N * C * H * W)
    return -(loss_point + loss_background)


def focal_loss_ref(output, labels, alfa=2.0, beta=4.0):
    """Pure-JAX reference matching the PyTorch module."""
    p = jnp.clip(jax.nn.sigmoid(output), 0.0, 1.0 - 1e-4)
    N, C, H, W = output.shape
    onehot = (labels[:, None, :, :] == jnp.arange(C)[None, :, None, None]
              ).astype(p.dtype)
    pos_vals = (1.0 - p) ** alfa * jnp.log(p + 1e-5)
    loss_point = jnp.sum(pos_vals * onehot) / jnp.sum(onehot)
    loss_background = jnp.mean(
        (1.0 - onehot) ** beta * p ** alfa * jnp.log(1.0 - p + 1e-5))
    return -(loss_point + loss_background)


if __name__ == "__main__":
    key = jax.random.PRNGKey(0)
    k1, k2 = jax.random.split(key)

    N, C, H, W = 2, 4, 16, 16
    output = jax.random.normal(k1, (N, C, H, W), dtype=jnp.float32)
    labels = jax.random.randint(k2, (N, H, W), 0, C, dtype=jnp.int32)

    loss = focal_loss_pallas(output, labels)
    loss = jax.block_until_ready(loss)

    ref = focal_loss_ref(output, labels)
    assert jnp.allclose(loss, ref, rtol=1e-5, atol=1e-5), (loss, ref)
    print("KERNEL_OK")
</pallas_src>

<mosaic_0001>
module attributes {stable_mosaic.version = 11 : i64} {
  func.func @_focal_loss_kernel(%arg0: i32, %arg1: i32, %arg2: i32, %arg3: memref<1x1x8x128xf32, #tpu.memory_space<vmem>>, %arg4: memref<1x8x128xi32, #tpu.memory_space<vmem>>, %arg5: memref<1x1x8x128xf32, #tpu.memory_space<vmem>>, %arg6: memref<8x128xf32, #tpu.memory_space<vmem>>, %arg7: memref<1x128xf32, #tpu.memory_space<vmem>>) attributes {dimension_semantics = [#tpu.dimension_semantics<parallel>, #tpu.dimension_semantics<parallel>, #tpu.dimension_semantics<arbitrary>], iteration_bounds = array<i64: 2, 1, 4>, scalar_prefetch = 0 : i64, scratch_operands = 2 : i64, tpu.core_type = #tpu.core_type<tc>, window_params = [{transform_indices = @transform_0, window_bounds = array<i64: 1, 1, 8, 128>}, {transform_indices = @transform_1, window_bounds = array<i64: 1, 8, 128>}, {transform_indices = @transform_2, window_bounds = array<i64: 1, 1, 8, 128>}]} {
    %c0_i32 = arith.constant 0 : i32
    %0 = arith.cmpi eq, %arg2, %c0_i32 : i32
    %1 = arith.extui %0 : i1 to i32
    %c0_i32_0 = arith.constant 0 : i32
    %2 = arith.cmpi ne, %1, %c0_i32_0 : i32
    scf.if %2 {
      %cst_23 = arith.constant 0.000000e+00 : f32
      %41 = vector.broadcast %cst_23 : f32 to vector<8x128xf32>
      %c0_24 = arith.constant 0 : index
      %c0_25 = arith.constant 0 : index
      %42 = vector.load %arg6[%c0_24, %c0_25] : memref<8x128xf32, #tpu.memory_space<vmem>>, vector<8x128xf32>
      tpu.vector_store %arg6[%c0_24, %c0_25], %41 {strides = array<i32>} : memref<8x128xf32, #tpu.memory_space<vmem>>, vector<8x128xf32>,
      %cst_26 = arith.constant 0.000000e+00 : f32
      %43 = vector.broadcast %cst_26 : f32 to vector<1x128xf32>
      %c0_27 = arith.constant 0 : index
      %c0_28 = arith.constant 0 : index
      %44 = vector.load %arg7[%c0_27, %c0_28] : memref<1x128xf32, #tpu.memory_space<vmem>>, vector<1x128xf32>
      tpu.vector_store %arg7[%c0_27, %c0_28], %43 {strides = array<i32>} : memref<1x128xf32, #tpu.memory_space<vmem>>, vector<1x128xf32>,
    } else {
    }
    %c0 = arith.constant 0 : index
    %c0_1 = arith.constant 0 : index
    %c0_2 = arith.constant 0 : index
    %c0_3 = arith.constant 0 : index
    %3 = vector.load %arg3[%c0, %c0_1, %c0_2, %c0_3] : memref<1x1x8x128xf32, #tpu.memory_space<vmem>>, vector<1x1x8x128xf32>
    %4 = vector.shape_cast %3 : vector<1x1x8x128xf32> to vector<8x128xf32>
    %c0_4 = arith.constant 0 : index
    %c0_5 = arith.constant 0 : index
    %c0_6 = arith.constant 0 : index
    %5 = vector.load %arg4[%c0_4, %c0_5, %c0_6] : memref<1x8x128xi32, #tpu.memory_space<vmem>>, vector<1x8x128xi32>
    %6 = vector.shape_cast %5 : vector<1x8x128xi32> to vector<8x128xi32>
    %cst = arith.constant 5.000000e-01 : f32
    %7 = vector.broadcast %cst : f32 to vector<8x128xf32>
    %8 = arith.mulf %7, %4 : vector<8x128xf32>
    %9 = math.tanh %8 : vector<8x128xf32>
    %cst_7 = arith.constant 5.000000e-01 : f32
    %10 = vector.broadcast %cst_7 : f32 to vector<8x128xf32>
    %11 = arith.mulf %10, %9 : vector<8x128xf32>
    %cst_8 = arith.constant 5.000000e-01 : f32
    %12 = vector.broadcast %cst_8 : f32 to vector<8x128xf32>
    %13 = arith.addf %11, %12 : vector<8x128xf32>
    %cst_9 = arith.constant 0.000000e+00 : f32
    %cst_10 = arith.constant 0.999899983 : f32
    %14 = vector.broadcast %cst_9 : f32 to vector<8x128xf32>
    %15 = arith.maximumf %14, %13 : vector<8x128xf32>
    %16 = vector.broadcast %cst_10 : f32 to vector<8x128xf32>
    %17 = arith.minimumf %16, %15 : vector<8x128xf32>
    %18 = vector.broadcast %arg2 : i32 to vector<8x128xi32>
    %19 = arith.cmpi eq, %6, %18 : vector<8x128xi32>
    %20 = arith.extui %19 : vector<8x128xi1> to vector<8x128xi32>
    %21 = arith.sitofp %20 : vector<8x128xi32> to vector<8x128xf32>
    %22 = arith.mulf %17, %17 : vector<8x128xf32>
    %cst_11 = arith.constant 1.000000e+00 : f32
    %23 = vector.broadcast %cst_11 : f32 to vector<8x128xf32>
    %24 = arith.subf %23, %17 : vector<8x128xf32>
    %cst_12 = arith.constant 9.99999974E-6 : f32
    %25 = vector.broadcast %cst_12 : f32 to vector<8x128xf32>
    %26 = arith.addf %24, %25 : vector<8x128xf32>
    %27 = math.log %26 : vector<8x128xf32>
    %28 = arith.mulf %22, %27 : vector<8x128xf32>
    %c0_13 = arith.constant 0 : index
    %c0_14 = arith.constant 0 : index
    %29 = vector.load %arg6[%c0_13, %c0_14] : memref<8x128xf32, #tpu.memory_space<vmem>>, vector<8x128xf32>
    %30 = arith.mulf %21, %17 : vector<8x128xf32>
    %31 = arith.addf %29, %30 : vector<8x128xf32>
    %c0_15 = arith.constant 0 : index
    %c0_16 = arith.constant 0 : index
    %32 = vector.load %arg6[%c0_15, %c0_16] : memref<8x128xf32, #tpu.memory_space<vmem>>, vector<8x128xf32>
    tpu.vector_store %arg6[%c0_15, %c0_16], %31 {strides = array<i32>} : memref<8x128xf32, #tpu.memory_space<vmem>>, vector<8x128xf32>,
    %c0_17 = arith.constant 0 : index
    %c0_18 = arith.constant 0 : index
    %33 = vector.load %arg7[%c0_17, %c0_18] : memref<1x128xf32, #tpu.memory_space<vmem>>, vector<1x128xf32>
    %cst_19 = arith.constant dense<0.000000e+00> : vector<128xf32>
    %34 = vector.multi_reduction <add>, %28, %cst_19 [0] : vector<8x128xf32> to vector<128xf32>
    %35 = vector.shape_cast %34 : vector<128xf32> to vector<1x128xf32>
    %36 = arith.addf %33, %35 : vector<1x128xf32>
    %c0_20 = arith.constant 0 : index
    %c0_21 = arith.constant 0 : index
    %37 = vector.load %arg7[%c0_20, %c0_21] : memref<1x128xf32, #tpu.memory_space<vmem>>, vector<1x128xf32>
    tpu.vector_store %arg7[%c0_20, %c0_21], %36 {strides = array<i32>} : memref<1x128xf32, #tpu.memory_space<vmem>>, vector<1x128xf32>,
    %c3_i32 = arith.constant 3 : i32
    %38 = arith.cmpi eq, %arg2, %c3_i32 : i32
    %39 = arith.extui %38 : i1 to i32
    %c0_i32_22 = arith.constant 0 : i32
    %40 = arith.cmpi ne, %39, %c0_i32_22 : i32
    scf.if %40 {
      %c0_i32_23 = arith.constant 0 : i32
      %41 = vector.broadcast %c0_i32_23 : i32 to vector<8x128xi32>
      %42 = arith.cmpi sge, %6, %41 : vector<8x128xi32>
      %c4_i32 = arith.constant 4 : i32
      %43 = vector.broadcast %c4_i32 : i32 to vector<8x128xi32>
      %44 = arith.cmpi slt, %6, %43 : vector<8x128xi32>
      %45 = arith.andi %42, %44 : vector<8x128xi1>
      %46 = arith.extui %45 : vector<8x128xi1> to vector<8x128xi32>
      %47 = arith.sitofp %46 : vector<8x128xi32> to vector<8x128xf32>
      %c0_24 = arith.constant 0 : index
      %c0_25 = arith.constant 0 : index
      %48 = vector.load %arg6[%c0_24, %c0_25] : memref<8x128xf32, #tpu.memory_space<vmem>>, vector<8x128xf32>
      %cst_26 = arith.constant 1.000000e+00 : f32
      %49 = vector.broadcast %cst_26 : f32 to vector<8x128xf32>
      %50 = arith.subf %49, %48 : vector<8x128xf32>
      %51 = arith.mulf %50, %50 : vector<8x128xf32>
      %52 = arith.mulf %47, %51 : vector<8x128xf32>
      %cst_27 = arith.constant 9.99999974E-6 : f32
      %53 = vector.broadcast %cst_27 : f32 to vector<8x128xf32>
      %54 = arith.addf %48, %53 : vector<8x128xf32>
      %55 = math.log %54 : vector<8x128xf32>
      %56 = arith.mulf %52, %55 : vector<8x128xf32>
      %57 = arith.mulf %48, %48 : vector<8x128xf32>
      %58 = arith.mulf %47, %57 : vector<8x128xf32>
      %cst_28 = arith.constant 9.99999974E-6 : f32
      %59 = vector.broadcast %cst_28 : f32 to vector<8x128xf32>
      %60 = arith.addf %50, %59 : vector<8x128xf32>
      %61 = math.log %60 : vector<8x128xf32>
      %62 = arith.mulf %58, %61 : vector<8x128xf32>
      %63 = vector.shape_cast %62 : vector<8x128xf32> to vector<1x8x128xf32>
      %cst_29 = arith.constant dense<0.000000e+00> : vector<1xf32>
      %64 = vector.multi_reduction <add>, %63, %cst_29 [1, 2] : vector<1x8x128xf32> to vector<1xf32>
      %65 = vector.shape_cast %64 : vector<1xf32> to vector<1x1x1xf32>
      %66 = vector.extract %65[0, 0, 0] : f32 from vector<1x1x1xf32>
      %67 = vector.shape_cast %56 : vector<8x128xf32> to vector<1x8x128xf32>
      %cst_30 = arith.constant dense<0.000000e+00> : vector<1xf32>
      %68 = vector.multi_reduction <add>, %67, %cst_30 [1, 2] : vector<1x8x128xf32> to vector<1xf32>
      %69 = vector.shape_cast %68 : vector<1xf32> to vector<1x1x1xf32>
      %70 = vector.extract %69[0, 0, 0] : f32 from vector<1x1x1xf32>
      %71 = vector.shape_cast %47 : vector<8x128xf32> to vector<1x8x128xf32>
      %cst_31 = arith.constant dense<0.000000e+00> : vector<1xf32>
      %72 = vector.multi_reduction <add>, %71, %cst_31 [1, 2] : vector<1x8x128xf32> to vector<1xf32>
      %73 = vector.shape_cast %72 : vector<1xf32> to vector<1x1x1xf32>
      %74 = vector.extract %73[0, 0, 0] : f32 from vector<1x1x1xf32>
      %c0_32 = arith.constant 0 : index
      %c0_33 = arith.constant 0 : index
      %75 = vector.load %arg7[%c0_32, %c0_33] : memref<1x128xf32, #tpu.memory_space<vmem>>, vector<1x128xf32>
      %76 = vector.shape_cast %75 : vector<1x128xf32> to vector<1x1x128xf32>
      %cst_34 = arith.constant dense<0.000000e+00> : vector<1xf32>
      %77 = vector.multi_reduction <add>, %76, %cst_34 [1, 2] : vector<1x1x128xf32> to vector<1xf32>
      %78 = vector.shape_cast %77 : vector<1xf32> to vector<1x1x1xf32>
      %79 = vector.extract %78[0, 0, 0] : f32 from vector<1x1x1xf32>
      %80 = arith.subf %79, %66 : f32
      %81 = tpu.iota {dimensions = array<i32: 0>} : vector<8x128xi32>
      %c0_i32_35 = arith.constant 0 : i32
      %82 = vector.broadcast %c0_i32_35 : i32 to vector<8x128xi32>
      %83 = arith.cmpi eq, %81, %82 : vector<8x128xi32>
      %c1_i32 = arith.constant 1 : i32
      %84 = vector.broadcast %c1_i32 : i32 to vector<8x128xi32>
      %85 = arith.cmpi eq, %81, %84 : vector<8x128xi32>
      %c2_i32 = arith.constant 2 : i32
      %86 = vector.broadcast %c2_i32 : i32 to vector<8x128xi32>
      %87 = arith.cmpi eq, %81, %86 : vector<8x128xi32>
      %cst_36 = arith.constant 0.000000e+00 : f32
      %88 = vector.broadcast %80 : f32 to vector<8x128xf32>
      %89 = vector.broadcast %cst_36 : f32 to vector<8x128xf32>
      %90 = arith.select %87, %88, %89 : vector<8x128xi1>, vector<8x128xf32>
      %91 = vector.broadcast %74 : f32 to vector<8x128xf32>
      %92 = arith.select %85, %91, %90 : vector<8x128xi1>, vector<8x128xf32>
      %93 = vector.broadcast %70 : f32 to vector<8x128xf32>
      %94 = arith.select %83, %93, %92 : vector<8x128xi1>, vector<8x128xf32>
      %c0_37 = arith.constant 0 : index
      %c0_38 = arith.constant 0 : index
      %c0_39 = arith.constant 0 : index
      %c0_40 = arith.constant 0 : index
      %95 = vector.load %arg5[%c0_37, %c0_38, %c0_39, %c0_40] : memref<1x1x8x128xf32, #tpu.memory_space<vmem>>, vector<1x1x8x128xf32>
      %96 = vector.shape_cast %95 : vector<1x1x8x128xf32> to vector<8x128xf32>
      %97 = vector.shape_cast %94 : vector<8x128xf32> to vector<1x1x8x128xf32>
      tpu.vector_store %arg5[%c0_37, %c0_38, %c0_39, %c0_40], %97 {strides = array<i32>} : memref<1x1x8x128xf32, #tpu.memory_space<vmem>>, vector<1x1x8x128xf32>,
    } else {
    }
    return
  }
  func.func @transform_0(%arg0: i32, %arg1: i32, %arg2: i32) -> (i32, i32, i32, i32) {
    %c0_i32 = arith.constant 0 : i32
    %c0_i32_0 = arith.constant 0 : i32
    return %arg0, %arg2, %arg1, %c0_i32 : i32, i32, i32, i32
  }
  func.func @transform_1(%arg0: i32, %arg1: i32, %arg2: i32) -> (i32, i32, i32) {
    %c0_i32 = arith.constant 0 : i32
    %c0_i32_0 = arith.constant 0 : i32
    return %arg0, %arg1, %c0_i32 : i32, i32, i32
  }
  func.func @transform_2(%arg0: i32, %arg1: i32, %arg2: i32) -> (i32, i32, i32, i32) {
    %c0_i32 = arith.constant 0 : i32
    %c0_i32_0 = arith.constant 0 : i32
    %c0_i32_1 = arith.constant 0 : i32
    return %arg0, %arg1, %c0_i32, %c0_i32_0 : i32, i32, i32, i32
  }
}

</mosaic_0001>

<bundles_post_ra>
// kernel: tpu_custom_call.1
= control target key start
LH: loop header
LB: loop body
LE: loop exit
PB: predicated region body
PF: predicated region fallthrough
CT: control target
= control target key end

     0   :  { %s1043_s0 = inlined_call_operand.hbm [shape: f32[2,4,8,128], index: 0, kind: input, shape index: {}]   ;;  %s1044_s1 = inlined_call_operand.hbm [shape: s32[2,8,128], index: 1, kind: input, shape index: {}]   ;;  %s1045_s2 = inlined_call_operand.hbm [shape: f32[2,1,8,128], index: 2, kind: output, shape index: {}]  }
   0x1   :  { %1051 = sst [smem:[#allocation17_spill]] %s1043_s0 }
   0x2   :  { %7 = vsyncpa [#allocation5], 0 }
   0x3   :  { %9 = vsyncpa [#allocation5 + $0x1], 0 }
   0x4   :  { %10 = vsyncpa [#allocation8], 0 }
   0x5   :  { %12 = vsyncpa [#allocation8 + $0x1], 0 }
   0x6   :  { %13 = vsyncpa [#allocation6], 0 }
   0x7   :  { %15 = vsyncpa [#allocation6 + $0x1], 0  ;;  %s825_s9 = smov 0   ;;  %s827_s10 = smov 0  }
   0x8   :  { %s829_s11 = smov 0   ;;  %s831_s12 = smov 0  }
   0x9   :  { %s833_s13 = smov 0   ;;  %s835_s14 = smov 0  }
   0xa   :  { %s837_s15 = smov 0   ;;  %s839_s16 = smov 0  }
   0xb   :  { %s841_s17 = smov 0   ;;  %s843_s18 = smov 0  }
   0xc   :  { %s845_s19 = smov 0  }
   0xd LB: > { %1052 = sst [smem:[#allocation13_spill]] %s797_s17  ;;  %s1046_s20 = sadd.s32 4294967295, %s805_s19   ;;  %s805_s19 = sphi %s845_s19, %s21_s19   ;;  %s801_s18 = sphi %s843_s18, %s1068_s18   ;;  %s797_s17 = sphi %s841_s17, %s1067_s17   ;;  %s793_s16 = sphi %s839_s16, %s1066_s16   ;;  %s789_s15 = sphi %s837_s15, %s1065_s15   ;;  %s785_s14 = sphi %s835_s14, %s1074_s14   ;;  %s781_s13 = sphi %s833_s13, %s1073_s13   ;;  %s777_s12 = sphi %s831_s12, %s1072_s12   ;;  %s773_s11 = sphi %s829_s11, %s1071_s11   ;;  %s769_s10 = sphi %s827_s10, %s1070_s10   ;;  %s765_s9 = sphi %s825_s9, %s1069_s9  }
   0xe   : > { %1053 = sst [smem:[#allocation14_spill]] %s801_s18  ;;  %s33_s21 = sadd.s32 1, %s797_s17 }
   0xf   : > { %p34_p0 = scmp.ge.s32.totalorder %s33_s21, 4  ;;  %s40_s22 = sadd.s32 1, %s801_s18 }
  0x10   : > { %s51_s23 = sadd.s32 1, %s785_s14  ;;  %p58_p1 = scmp.ne.s32.totalorder %s785_s14, %s781_s13 }
  0x11   : > { %s1076_s21 = smov (%p34_p0, %s33_s21), 0  ;;  %s1078_s22 = smov (!%p34_p0, %s40_s22), %s801_s18 }
  0x12   : > { %1054 = sst [smem:[#allocation15_spill]] %s1076_s21  ;;  %s45_s24 = ssub.s32 %s797_s17, %s1076_s21 }
  0x13   : > { %p59_p2 = scmp.eq.s32.totalorder %s805_s19, 0  ;;  %p42_p3 = scmp.ge.s32.totalorder %s1078_s22, 2 }
  0x14   : > { %p64_p4 = scmp.ne.s32.totalorder %s781_s13, %s777_s12  ;;  %p899_p6 = scmp.eq.s32.totalorder %s1046_s20, 0 }
  0x15   : > { %p893_p5 = por %p59_p2, %p58_p1  ;;  %s1080_s22 = smov (%p42_p3, %s1078_s22), 0 }
  0x16   : > { %1057 = sst [smem:[#allocation16_spill]] %s1080_s22  ;;  %p907_p7 = por %p899_p6, %p64_p4 }
  0x17   : > { %s44_s28 = ssub.s32 %s801_s18, %s1080_s22  ;;  %p518_p8 = scmp.lt.s32.totalorder %s805_s19, 8 }
  0x18   : > { %s46_s29 = sor.u32 %s45_s24, %s44_s28  ;;  %p77_p9 = scmp.eq.s32.totalorder %s44_s28, 0 }
  0x19   : > { %p49_p10 = scmp.eq.s32.totalorder %s46_s29, 0  ;;  %s144_s30 = sand.u32 1, %s785_s14  }
  0x1a   : > { %s476_s3 = sshll.u32 %s144_s30, 3  ;;  %s477_s5 = sshll.u32 %s801_s18, 2 }
  0x1b   : > { %s916_s4 = scalar_select %p49_p10, %s785_s14, %s51_s23  }
  0x1c   : > { %s153_s6 = sadd.s32 %s797_s17, %s477_s5  ;;  %s148_s7 = scalar_lea.vmem [#allocation4], %s476_s3 }
  0x1d   : > { %s159_s8 = sshll.u32 %s148_s7, 4  ;;  %s478_s12 = sshll.u32 %s153_s6, 3  ;;  %s160_s8 = int_to_ptr.vmem [resolvable:$true] %s159_s8 }
  0x1e   : > { %s1059_s0 = sld [smem:[#allocation17_spill]]  ;;  %p508_p11 = pnand %p518_p8, %p893_p5 }
  0x1f   : > { %p481_p12 = scmp.ge.s32.totalorder %s805_s19, 1  ;;  %s145_s3 = scalar_lea.sflag [#allocation5], %s144_s30 }
  0x20   : > { %p184_p13 = scmp.lt.s32.totalorder %s805_s19, 9  ;;  %s473_s6 = sadd.s32 4294967294, %s805_s19  }
  0x21   : > { %s79_s7 = sadd.s32 1, %s773_s11  ;;  %p86_p1 = scmp.ne.s32.totalorder %s773_s11, %s769_s10 }
  0x22   : > { %p929_p0 = pnand %p481_p12, %p184_p13  ;;  %p92_p3 = scmp.ne.s32.totalorder %s769_s10, %s765_s9 }
  0x23   : > { %s937_s25 = scalar_select %p77_p9, %s773_s11, %s79_s7  }
  0x24   : > { %s155_s20 = scalar_lea.hbm %s1059_s0, %s478_s12  ;;  %p124_p5 = scmp.eq.s32.totalorder %s473_s6, 7 }
  0x25   : > { %s157_s23 = sshll.u32 %s155_s20, 4  ;;  %s1061_s20 = sadd.s32 4294967295, %s805_s19   ;;  %s158_s23 = int_to_ptr.hbm [resolvable:$true] %s157_s23 }
  0x26   : > { %510 = dma.hbm_to_vmem [thread:$0]  (!%p508_p11), %s158_s23, 128, %s160_s8, %s145_s3  }
  0x27   : > { %p118_p4 = scmp.eq.s32.totalorder %s1061_s20, 7  ;;  %p947_p10 = por %p92_p3, %p899_p6 }
  0x28   : > { %p955_p12 = por %p124_p5, %p92_p3  ;;  %s166_s28 = sand.u32 1, %s773_s11  }
  0x29   : > { %p951_p11 = por %p118_p4, %p86_p1  ;;  %s480_s24 = sshll.u32 %s801_s18, 3 }
  0x2a   : > { %p88_p9 = por %p86_p1, %p59_p2  ;;  %s479_s29 = sshll.u32 %s166_s28, 3 }
  0x2b   : > { %s175_s26 = scalar_lea.hbm %s1044_s1, %s480_s24  ;;  %s170_s7 = scalar_lea.vmem [#allocation7], %s479_s29 }
  0x2c   : > { %s177_s6 = sshll.u32 %s175_s26, 4  ;;  %s179_s20 = sshll.u32 %s170_s7, 4  ;;  %s178_s6 = int_to_ptr.hbm [resolvable:$true] %s177_s6  ;;  %s180_s20 = int_to_ptr.vmem [resolvable:$true] %s179_s20 }
  0x2d   : > { %p511_p6 = pnand %p518_p8, %p88_p9  ;;  %s167_s0 = scalar_lea.sflag [#allocation8], %s166_s28 }
  0x2e   : > { %188 = sbr.rel (%p929_p0) target bundleno = 340 (0x154), region = 28  ;;  %s190_s22 = sand.u32 (!%p929_p0), 1, %s781_s13  }
  0x2f   : > { %513 = dma.hbm_to_vmem [thread:$0]  (!%p511_p6), %s178_s6, 128, %s180_s20, %s167_s0  }
  0x30   : > { %s482_s21 = sshll.u32 (!%p929_p0), %s190_s22, 3  ;;  %s191_s18 = scalar_lea.sflag (!%p929_p0), [#allocation5], %s190_s22 }
  0x31   : > { %s194_s17 = scalar_lea.vmem (!%p929_p0), [#allocation4], %s482_s21 }
  0x33   : > { %752 = dma.done.wait (%p907_p7), %s191_s18, 128  }
  0x34   : > { %754 = vsyncadd (%p907_p7), %s191_s18, 4294967168  ;;  %s976_s24 = sand.u32 1, %s769_s10  }
  0x35   : > { %s483_s0 = sshll.u32 %s976_s24, 3  ;;  %s201_s5 = scalar_lea.sflag [#allocation8], %s976_s24 }
  0x36   : > { %s204_s28 = scalar_lea.vmem [#allocation7], %s483_s0 }
  0x37   : > { %756 = dma.done.wait (%p947_p10), %s201_s5, 128  }
  0x38   : > { %758 = vsyncadd (%p947_p10), %s201_s5, 4294967168  ;;  %s984_s21 = scalar_lea.vmem [#allocation9], %s483_s0  ;;  %p485_p2 = scmp.ne.s32.totalorder %s789_s15, 0 }
  0x3a   : > { %234 = sbr.rel (%p485_p2) target bundleno = 66 (0x42), region = 40 }
  0x3f   : > { %v807_v0 = vmov 0.0  }
  0x40   : > { %235 = vst [vmem:[#allocation2] sm:$0xff] %v807_v0 }
  0x41   : > { %236 = vst [vmem:[#allocation3] sm:$0x1] %v807_v0 }
  0x42 PF: > { %v237_v1 = vld [vmem:[%s194_s17] sm:$0xff]  ;;  %v238_v4 = vld [vmem:[%s204_s28] sm:$0xff]  ;;  %v245_v5 = vstv %s789_s15  ;;  %v808_v9 = vmov 0.0   ;;  %p487_p7 = scmp.ne.s32.totalorder %s789_s15, 3 }
  0x43   : > { %v239_v2 = vmul.f32 0.5, %v237_v1  ;;  %vm246_vm0 = vcmp.eq.s32.totalorder %v238_v4, %v245_v5 }
  0x44   : > { %v486_v10 = vsel %vm246_vm0, 1.0, %v808_v9 }
  0x45   : > { %611 = vtanh.f32 %v239_v2 }
  0x47   : > { %v255_v12 = vld [vmem:[#allocation2] sm:$0xff] }
  0x48   : > { %v259_v26 = vld [vmem:[#allocation3] sm:$0x1] }
  0x4b   : > { %v612_v3 = vpop.eup %611 }
  0x4c   : > { %v241_v6 = vmul.f32 0.5, %v612_v3 }
  0x4e   : > { %v242_v7 = vadd.f32 0.5, %v241_v6 }
  0x50   : > { %v243_v8 = vmax.f32 %v242_v7, 0.0 }
  0x52   : > { %v244_v11 = vmin.f32 %v243_v8, 0.9999 }
  0x54   : > { %v250_v13 = vsub.f32 1.0, %v244_v11  ;;  %v256_v14 = vmul.f32 %v486_v10, %v244_v11  ;;  %v249_v17 = vmul.f32 %v244_v11, %v244_v11 }
  0x56   : > { %v251_v15 = vadd.f32 1e-05, %v250_v13  ;;  %v257_v16 = vadd.f32 %v256_v14, %v255_v12 }
  0x58   : > { %258 = vst [vmem:[#allocation2] sm:$0xff] %v257_v16  ;;  %613 = vlog2.f32 %v251_v15 }
  0x5e   : > { %v614_v18 = vpop.eup %613 }
  0x5f   : > { %v253_v19 = vmul.f32 0.6931472, %v614_v18 }
  0x61   : > { %v254_v20 = vmul.f32 %v253_v19, %v249_v17 }
  0x63   : > { %v260_v21 = vrot.slane %v254_v20, 4 }
  0x65   : > { %v261_v22 = vadd.f32 %v260_v21, %v254_v20 }
  0x67   : > { %v262_v23 = vrot.slane %v261_v22, 2 }
  0x69   : > { %v263_v24 = vadd.f32 %v262_v23, %v261_v22 }
  0x6b   : > { %v264_v25 = vrot.slane %v263_v24, 1 }
  0x6d   : > { %v265_v27 = vadd.f32 %v264_v25, %v263_v24  ;;  %271 = sbr.rel (%p487_p7) target bundleno = 325 (0x145), region = 44 }
  0x6f   : > { %v266_v28 = vadd.f32 %v265_v27, %v259_v26 }
  0x71   : > { %267 = vst [vmem:[#allocation3] sm:$0x1] %v266_v28 }
  0x72   : > { %vm272_vm1 = vcmp.ge.s32.totalorder %v238_v4, 0  ;;  %vm273_vm2 = vcmp.lt.s32.totalorder %v238_v4, 4  ;;  %v277_v29 = vld [vmem:[#allocation2] sm:$0xff]  ;;  %v809_v31 = vmov 0.0   ;;  %vm319_vm4 = vcmask 1040384  }
  0x73   : > { %vm274_vm3 = vmand %vm272_vm1, %vm273_vm2  ;;  %v278_v30 = vsub.f32 1.0, %v277_v29  ;;  %v281_v34 = vadd.f32 1e-05, %v277_v29  ;;  %v285_v36 = vmul.f32 %v277_v29, %v277_v29  ;;  %v331_v11 = vlaneseq }
  0x74   : > { %v488_v32 = vsel %vm274_vm3, 1.0, %v809_v31 }
  0x75   : > { %309 = vadd.xlane.f32.xlu1 %v488_v32  ;;  %v287_v33 = vadd.f32 1e-05, %v278_v30  ;;  %v286_v38 = vmul.f32 %v488_v32, %v285_v36  ;;  %v279_v41 = vmul.f32 %v278_v30, %v278_v30  ;;  %v332_v12 = vshrl.u32 %v331_v11, 7 }
  0x77   : > { %615 = vlog2.f32 %v287_v33  ;;  %v280_v44 = vmul.f32 %v488_v32, %v279_v41  ;;  %vm335_vm5 = vcmp.eq.s32.totalorder %v332_v12, 2  ;;  %vm334_vm6 = vcmp.eq.s32.totalorder %v332_v12, 1 }
  0x78   : > { %v318_v35 = vld [vmem:[#allocation3] sm:$0x1]  ;;  %617 = vlog2.f32 %v281_v34  ;;  %vm333_vm7 = vcmp.eq.s32.totalorder %v332_v12, 0 }
  0x79   : > { %v320_v37 = vsel %vm319_vm4, %v318_v35, 0.0 }
  0x7d   : > { %v616_v39 = vpop.eup %615  ;;  %321 = vadd.xlane.f32.xlu1 %v320_v37 }
  0x7e   : > { %v289_v40 = vmul.f32 0.6931472, %v616_v39  ;;  %v618_v42 = vpop.eup %617 }
  0x7f   : > { %v283_v45 = vmul.f32 0.6931472, %v618_v42 }
  0x80   : > { %v290_v43 = vmul.f32 %v289_v40, %v286_v38 }
  0x81   : > { %v284_v46 = vmul.f32 %v283_v45, %v280_v44 }
  0x82   : > { %291 = vadd.xlane.f32.xlu0 %v290_v43 }
  0x8a   : > { %300 = vadd.xlane.f32.xlu0 %v284_v46 }
  0xe8   : > { %v310_v47 = vpop.xlane.xlu1 %309 }
  0xe9   : > { %v311_v49 = vrot.slane %v310_v47, 4 }
  0xeb   : > { %v312_v54 = vadd.f32 %v311_v49, %v310_v47 }
  0xed   : > { %v313_v58 = vrot.slane %v312_v54, 2 }
  0xef   : > { %v314_v1 = vadd.f32 %v313_v58, %v312_v54 }
  0xf0   : > { %v322_v48 = vpop.xlane.xlu1 %321 }
  0xf1   : > { %v323_v52 = vrot.slane %v322_v48, 4  ;;  %v315_v5 = vrot.slane %v314_v1, 1 }
  0xf3   : > { %v324_v56 = vadd.f32 %v323_v52, %v322_v48  ;;  %v316_v9 = vadd.f32 %v315_v5, %v314_v1 }
  0xf5   : > { %v292_v50 = vpop.xlane.xlu0 %291  ;;  %v325_v60 = vrot.slane %v324_v56, 2 }
  0xf6   : > { %v293_v51 = vrot.slane %v292_v50, 4 }
  0xf7   : > { %v326_v2 = vadd.f32 %v325_v60, %v324_v56 }
  0xf8   : > { %v294_v53 = vadd.f32 %v293_v51, %v292_v50 }
  0xf9   : > { %v327_v7 = vrot.slane %v326_v2, 1 }
  0xfa   : > { %v295_v55 = vrot.slane %v294_v53, 2 }
  0xfb   : > { %v328_v10 = vadd.f32 %v327_v7, %v326_v2 }
  0xfc   : > { %v296_v57 = vadd.f32 %v295_v55, %v294_v53 }
  0xfd   : > { %v301_v59 = vpop.xlane.xlu0 %300 }
  0xfe   : > { %v302_v61 = vrot.slane %v301_v59, 4  ;;  %v297_v62 = vrot.slane %v296_v57, 1 }
 0x100   : > { %v303_v63 = vadd.f32 %v302_v61, %v301_v59  ;;  %v298_v0 = vadd.f32 %v297_v62, %v296_v57 }
 0x102   : > { %v304_v3 = vrot.slane %v303_v63, 2  ;;  %493 = vpush %v298_v0 }
 0x104   : > { %v305_v4 = vadd.f32 %v304_v3, %v303_v63 }
 0x106   : > { %v306_v6 = vrot.slane %v305_v4, 1 }
 0x108   : > { %v307_v8 = vadd.f32 %v306_v6, %v305_v4 }
 0x10a   : > { %495 = vpush %v307_v8 }
 0x10b   : > { %497 = vpush %v316_v9 }
 0x10c   : > { %499 = vpush %v328_v10 }
 0x133   : > { %s494_s15 = spop %493 }
 0x13b   : > { %s496_s17 = spop %495 }
 0x13c   : > { %s498_s18 = spop %497  ;;  %v340_v16 = vstv %s496_s17 }
 0x13d   : > { %s500_s22 = spop %499  ;;  %v338_v14 = vstv %s498_s18 }
 0x13e   : > { %s330_s27 = ssub.f32 %s500_s22, %s494_s15 }
 0x140   : > { %v336_v13 = vstv %s330_s27 }
 0x141   : > { %v337_v15 = vsel %vm335_vm5, %v336_v13, 0.0 }
 0x142   : > { %v339_v17 = vsel %vm334_vm6, %v338_v14, %v337_v15 }
 0x143   : > { %v341_v18 = vsel %vm333_vm7, %v340_v16, %v339_v17 }
 0x144   : > { %342 = vst [vmem:[%s984_s21] sm:$0xff] %v341_v18 }
 0x145 PF: > { %s490_s30 = sshll.u32 %s793_s16, 3  ;;  %s357_s26 = sshll.u32 %s984_s21, 4  ;;  %s358_s26 = int_to_ptr.vmem [resolvable:$true] %s357_s26 }
 0x146   : > { %s355_s3 = scalar_lea.hbm %s1045_s2, %s490_s30  ;;  %s344_s7 = scalar_lea.sflag [#allocation6], %s976_s24 }
 0x147   : > { %s359_s6 = sshll.u32 %s355_s3, 4  ;;  %s699_s16 = scalar_lea.hbm %s1045_s2, 16  ;;  %s360_s6 = int_to_ptr.hbm [resolvable:$true] %s359_s6 }
 0x148   : > { %s693_s20 = sshra.s32 %s360_s6, 4  ;;  %s694_s20 = int_to_ptr.hbm [resolvable:$true] %s693_s20 }
 0x149   : > { %s695_s0 = scalar_lea.hbm %s694_s20, 8  ;;  %p700_p1 = scmp.lt.s32.totalorder %s694_s20, %s1045_s2 }
 0x14a   : > { %p696_p8 = scmp.ne.s32.totalorder %s694_s20, %s695_s0  ;;  %p701_p3 = scmp.lt.s32.totalorder %s699_s16, %s695_s0 }
 0x14c   : > { %p697_p13 = pnand %p696_p8, %p951_p11  ;;  %p702_p4 = por %p701_p3, %p700_p1 }
 0x14e   : > { %p698_p0 = pneg %p697_p13 }
 0x150   : > { %p703_p5 = pnand %p702_p4, %p698_p0 }
 0x152   : > { %706 = shalt.err (!%p703_p5)
}
 0x153   : > { %505 = dma.vmem_to_hbm [thread:$0]  (%p951_p11), %s358_s26, 128, %s360_s6, %s344_s7  }
 0x154 PF: > { %p519_p10 = scmp.ge.s32.totalorder %s805_s19, 2  ;;  %s371_s24 = sand.u32 1, %s765_s9  }
 0x155   : > { %s372_s21 = scalar_lea.sflag [#allocation6], %s371_s24 }
 0x156   : > { %p515_p9 = pnand %p519_p10, %p955_p12 }
 0x158   : > { %p516_p6 = pneg %p515_p9 }
 0x15a   : > { %760 = dma.done.wait (%p516_p6), %s372_s21, 128  }
 0x15b   : > { %762 = vsyncadd (%p516_p6), %s372_s21, 4294967168  ;;  %s21_s19 = sadd.s32 1, %s805_s19   ;;  %s1065_s15 = sld [smem:[#allocation13_spill]] }
 0x15c   : > { %p18_p2 = scmp.ge.s32.totalorder %s21_s19, 10   ;;  %s1066_s16 = sld [smem:[#allocation14_spill]] }
 0x15d   : > { %s1067_s17 = sld [smem:[#allocation15_spill]]  ;;  %s1069_s9 = smov %s769_s10 }
 0x15e   : > { %s1068_s18 = sld [smem:[#allocation16_spill]]  ;;  %s1070_s10 = smov %s773_s11 }
 0x15f   : > { %s1071_s11 = smov %s937_s25  ;;  %s1072_s12 = smov %s781_s13 }
 0x160   : > { %s1073_s13 = smov %s785_s14  ;;  %s1074_s14 = smov %s916_s4 }
 0x161   :  { %20 = sbr.rel (!%p18_p2) target bundleno = 13 (0xd), region = 94 }
 0x166   :  { %378 = vsyncpa [#allocation5], 1 }
 0x167   :  { %380 = vsyncpa [#allocation5 + $0x1], 1 }
 0x168   :  { %381 = vsyncpa [#allocation8], 1 }
 0x169   :  { %383 = vsyncpa [#allocation8 + $0x1], 1 }
 0x16a   :  { %384 = vsyncpa [#allocation6], 1 }
 0x16b   :  { %386 = vsyncpa [#allocation6 + $0x1], 1 }

</bundles_post_ra>
